<compile_context>
chip_gen: v7x
topology: tpu7x:2x2x1
jax: 0.10.0
libtpu: 0.0.40
codegen_flags: <defaults>
</compile_context>

<pallas_src>
import functools

import jax
import jax.numpy as jnp
from jax.experimental import pallas as pl
from jax.experimental.pallas import tpu as pltpu


def _se_kernel(x_ref, w1_ref, b1_ref, w2_ref, b2_ref, o_ref, *, inv_hw, use_mxu):
    # x_ref: (Bblk, C, HWp) in the input's native dtype.
    xb = x_ref[...]

    # --- Squeeze: global average pool over the spatial (lane) axis. ---
    # Accumulate in f32 without materializing an f32 copy of the slab; padded
    # spatial columns are zero so they don't perturb the sum, and we divide by
    # the *real* H*W via inv_hw.
    pooled = jnp.sum(xb, axis=2, dtype=jnp.float32) * inv_hw            # (Bblk, C)

    # --- Excite: 1x1 conv -> ReLU -> 1x1 conv -> sigmoid (all f32). ---
    if use_mxu:
        # Production channel counts: batched MXU matmuls over the Bblk samples.
        h = jnp.dot(pooled, w1_ref[...],
                    preferred_element_type=jnp.float32) + b1_ref[...]   # (Bblk, hidden)
        h = jnp.maximum(h, 0.0)
        z = jnp.dot(h, w2_ref[...],
                    preferred_element_type=jnp.float32) + b2_ref[...]   # (Bblk, C)
    else:
        # Tiny C / hidden: broadcast-multiply + reduce on VPU/XLU, off the MXU.
        h = jnp.sum(pooled[:, :, None] * w1_ref[...][None, :, :], axis=1) + b1_ref[...]
        h = jnp.maximum(h, 0.0)                                          # (Bblk, hidden)
        z = jnp.sum(h[:, :, None] * w2_ref[...][None, :, :], axis=1) + b2_ref[...]
    s = jax.nn.sigmoid(z)                                                # (Bblk, C) f32

    # --- Scale: multiply in f32, single downcast at the lane-dense store. ---
    o_ref[...] = (xb * s[:, :, None]).astype(o_ref.dtype)


def se_forward(x, conv1_w, conv1_b, conv2_w, conv2_b):
    """Pallas implementation of SE.forward.

    x       : (B, C, H, W)        (NCHW, like PyTorch)
    conv1_w : (hidden, C)         (1x1 conv weight, spatial dims squeezed)
    conv1_b : (hidden,)
    conv2_w : (C, hidden)
    conv2_b : (C,)
    """
    B, C, H, W = x.shape
    hidden = conv1_w.shape[0]
    HW = H * W

    # Lane-dense spatial axis: pad H*W up to a multiple of 128 so the hot
    # writeback is an unmasked full-lane vst (padding sliced off afterwards).
    HWp = ((HW + 127) // 128) * 128
    x3 = x.reshape(B, C, HW)
    if HWp != HW:
        x3 = jnp.pad(x3, ((0, 0), (0, 0), (0, HWp - HW)))

    # --- Per-step batch block sizing (VMEM budget + megacore). ---
    itemsize = jnp.dtype(x.dtype).itemsize
    per_sample = C * HWp * itemsize
    # Double-buffered input + output blocks cost ~4x the slab; cap the slab at
    # ~6 MiB so everything fits v7x's 32 MiB default scoped-VMEM limit without
    # raising vmem_limit_bytes.  Keep >= 2 grid steps (when B allows) so both
    # v7x TensorCores' DMA engines work on this HBM-bound kernel.
    budget = 6 * 1024 * 1024
    bblk_cap = max(1, budget // per_sample)
    if B >= 2:
        bblk_cap = min(bblk_cap, max(1, B // 2))
    bblk = 1
    for d in range(1, B + 1):
        if B % d == 0 and d <= bblk_cap:
            bblk = d
    grid = (B // bblk,)

    # Kernel-friendly weight layouts (all tiny; prepared once in the wrapper).
    w1_k = jnp.asarray(conv1_w, jnp.float32).T.reshape(C, hidden)   # (C, hidden)
    b1_k = jnp.asarray(conv1_b, jnp.float32).reshape(1, hidden)     # (1, hidden)
    w2_k = jnp.asarray(conv2_w, jnp.float32).T.reshape(hidden, C)   # (hidden, C)
    b2_k = jnp.asarray(conv2_b, jnp.float32).reshape(1, C)          # (1, C)

    use_mxu = (C >= 128) and (hidden >= 32)
    kernel = functools.partial(_se_kernel, inv_hw=1.0 / HW, use_mxu=use_mxu)

    # Advisory cost: 1 read + 1 write of x, a handful of flops, B*C exps.
    cost = pl.CostEstimate(
        flops=3 * B * C * HWp + 4 * B * C * hidden,
        transcendentals=B * C,
        bytes_accessed=2 * B * C * HWp * itemsize
        + 4 * int(w1_k.size + b1_k.size + w2_k.size + b2_k.size),
    )

    out3 = pl.pallas_call(
        kernel,
        out_shape=jax.ShapeDtypeStruct((B, C, HWp), x.dtype),
        grid=grid,
        in_specs=[
            pl.BlockSpec((bblk, C, HWp), lambda b: (b, 0, 0)),   # batched sample slab
            pl.BlockSpec((C, hidden), lambda b: (0, 0)),         # weights: resident
            pl.BlockSpec((1, hidden), lambda b: (0, 0)),
            pl.BlockSpec((hidden, C), lambda b: (0, 0)),
            pl.BlockSpec((1, C), lambda b: (0, 0)),
        ],
        out_specs=pl.BlockSpec((bblk, C, HWp), lambda b: (b, 0, 0)),
        compiler_params=pltpu.CompilerParams(
            dimension_semantics=("parallel",),   # independent batch blocks -> megacore
        ),
        cost_estimate=cost,
    )(x3, w1_k, b1_k, w2_k, b2_k)

    if HWp != HW:
        out3 = out3[:, :, :HW]
    return out3.reshape(B, C, H, W)


if __name__ == "__main__":
    # Module hyper-params: SE(dim=4, ratio=8) -> hidden_dim = max(8, 4 // 8) = 8.
    dim, ratio = 4, 8
    hidden = max(8, dim // ratio)

    key = jax.random.PRNGKey(0)
    kx, k1, k2, k3, k4 = jax.random.split(key, 5)

    x = jax.random.normal(kx, (2, dim, 16, 16), dtype=jnp.float32)   # NCHW

    # 1x1-conv parameters (PyTorch layout, spatial 1x1 dims squeezed away).
    conv1_w = jax.random.normal(k1, (hidden, dim), jnp.float32) * 0.5
    conv1_b = jax.random.normal(k2, (hidden,), jnp.float32) * 0.1
    conv2_w = jax.random.normal(k3, (dim, hidden), jnp.float32) * 0.5
    conv2_b = jax.random.normal(k4, (dim,), jnp.float32) * 0.1

    y = jax.block_until_ready(se_forward(x, conv1_w, conv1_b, conv2_w, conv2_b))

    # Pure-JAX reference (same math as the PyTorch module).
    pooled = jnp.mean(x, axis=(2, 3))                               # (B, C)
    h_ref = jnp.maximum(pooled @ conv1_w.T + conv1_b, 0.0)          # (B, hidden)
    s_ref = jax.nn.sigmoid(h_ref @ conv2_w.T + conv2_b)             # (B, C)
    y_ref = x * s_ref[:, :, None, None]

    err = float(jnp.max(jnp.abs(y - y_ref)))
    assert err < 1e-4, f"mismatch vs reference: max abs err = {err}"

    print("KERNEL_OK")
</pallas_src>

<mosaic_0001>
module attributes {stable_mosaic.version = 11 : i64} {
  func.func @_se_kernel(%arg0: i32, %arg1: memref<1x4x256xf32, #tpu.memory_space<vmem>>, %arg2: memref<4x8xf32, #tpu.memory_space<vmem>>, %arg3: memref<1x8xf32, #tpu.memory_space<vmem>>, %arg4: memref<8x4xf32, #tpu.memory_space<vmem>>, %arg5: memref<1x4xf32, #tpu.memory_space<vmem>>, %arg6: memref<1x4x256xf32, #tpu.memory_space<vmem>>) attributes {dimension_semantics = [#tpu.dimension_semantics<parallel>], iteration_bounds = array<i64: 2>, scalar_prefetch = 0 : i64, scratch_operands = 0 : i64, tpu.core_type = #tpu.core_type<tc>, window_params = [{transform_indices = @transform_0, window_bounds = array<i64: 1, 4, 256>}, {pipeline_mode = #tpu.pipeline_mode<synchronous>, transform_indices = @transform_1, window_bounds = array<i64: 4, 8>}, {pipeline_mode = #tpu.pipeline_mode<synchronous>, transform_indices = @transform_2, window_bounds = array<i64: 1, 8>}, {pipeline_mode = #tpu.pipeline_mode<synchronous>, transform_indices = @transform_3, window_bounds = array<i64: 8, 4>}, {pipeline_mode = #tpu.pipeline_mode<synchronous>, transform_indices = @transform_4, window_bounds = array<i64: 1, 4>}, {transform_indices = @transform_5, window_bounds = array<i64: 1, 4, 256>}]} {
    %c0 = arith.constant 0 : index
    %c0_0 = arith.constant 0 : index
    %c0_1 = arith.constant 0 : index
    %0 = vector.load %arg1[%c0, %c0_0, %c0_1] : memref<1x4x256xf32, #tpu.memory_space<vmem>>, vector<1x4x256xf32>
    %cst = arith.constant dense<0.000000e+00> : vector<1x4xf32>
    %1 = vector.multi_reduction <add>, %0, %cst [2] : vector<1x4x256xf32> to vector<1x4xf32>
    %cst_2 = arith.constant 3.906250e-03 : f32
    %2 = vector.broadcast %cst_2 : f32 to vector<1x4xf32>
    %3 = arith.mulf %1, %2 : vector<1x4xf32>
    %4 = vector.shape_cast %3 : vector<1x4xf32> to vector<1x4x1xf32>
    %c0_3 = arith.constant 0 : index
    %c0_4 = arith.constant 0 : index
    %5 = vector.load %arg2[%c0_3, %c0_4] : memref<4x8xf32, #tpu.memory_space<vmem>>, vector<4x8xf32>
    %6 = vector.shape_cast %5 : vector<4x8xf32> to vector<1x4x8xf32>
    %7 = vector.broadcast %4 : vector<1x4x1xf32> to vector<1x4x8xf32>
    %8 = arith.mulf %7, %6 : vector<1x4x8xf32>
    %cst_5 = arith.constant dense<0.000000e+00> : vector<1x8xf32>
    %9 = vector.multi_reduction <add>, %8, %cst_5 [1] : vector<1x4x8xf32> to vector<1x8xf32>
    %c0_6 = arith.constant 0 : index
    %c0_7 = arith.constant 0 : index
    %10 = vector.load %arg3[%c0_6, %c0_7] : memref<1x8xf32, #tpu.memory_space<vmem>>, vector<1x8xf32>
    %11 = arith.addf %9, %10 : vector<1x8xf32>
    %cst_8 = arith.constant 0.000000e+00 : f32
    %12 = vector.broadcast %cst_8 : f32 to vector<1x8xf32>
    %13 = arith.maximumf %11, %12 : vector<1x8xf32>
    %14 = vector.shape_cast %13 : vector<1x8xf32> to vector<1x8x1xf32>
    %c0_9 = arith.constant 0 : index
    %c0_10 = arith.constant 0 : index
    %15 = vector.load %arg4[%c0_9, %c0_10] : memref<8x4xf32, #tpu.memory_space<vmem>>, vector<8x4xf32>
    %16 = vector.shape_cast %15 : vector<8x4xf32> to vector<1x8x4xf32>
    %17 = vector.broadcast %14 : vector<1x8x1xf32> to vector<1x8x4xf32>
    %18 = arith.mulf %17, %16 : vector<1x8x4xf32>
    %cst_11 = arith.constant dense<0.000000e+00> : vector<1x4xf32>
    %19 = vector.multi_reduction <add>, %18, %cst_11 [1] : vector<1x8x4xf32> to vector<1x4xf32>
    %c0_12 = arith.constant 0 : index
    %c0_13 = arith.constant 0 : index
    %20 = vector.load %arg5[%c0_12, %c0_13] : memref<1x4xf32, #tpu.memory_space<vmem>>, vector<1x4xf32>
    %21 = arith.addf %19, %20 : vector<1x4xf32>
    %22 = arith.negf %21 : vector<1x4xf32>
    %23 = math.exp %22 : vector<1x4xf32>
    %cst_14 = arith.constant 1.000000e+00 : f32
    %24 = vector.broadcast %cst_14 : f32 to vector<1x4xf32>
    %25 = arith.addf %24, %23 : vector<1x4xf32>
    %26 = arith.divf %24, %25 : vector<1x4xf32>
    %27 = vector.shape_cast %26 : vector<1x4xf32> to vector<1x4x1xf32>
    %28 = vector.broadcast %27 : vector<1x4x1xf32> to vector<1x4x256xf32>
    %29 = arith.mulf %0, %28 : vector<1x4x256xf32>
    %c0_15 = arith.constant 0 : index
    %c0_16 = arith.constant 0 : index
    %c0_17 = arith.constant 0 : index
    %30 = vector.load %arg6[%c0_15, %c0_16, %c0_17] : memref<1x4x256xf32, #tpu.memory_space<vmem>>, vector<1x4x256xf32>
    tpu.vector_store %arg6[%c0_15, %c0_16, %c0_17], %29 {strides = array<i32>} : memref<1x4x256xf32, #tpu.memory_space<vmem>>, vector<1x4x256xf32>,
    return
  }
  func.func @transform_0(%arg0: i32) -> (i32, i32, i32) {
    %c0_i32 = arith.constant 0 : i32
    %c0_i32_0 = arith.constant 0 : i32
    %c0_i32_1 = arith.constant 0 : i32
    return %arg0, %c0_i32, %c0_i32_0 : i32, i32, i32
  }
  func.func @transform_1(%arg0: i32) -> (i32, i32) {
    %c0_i32 = arith.constant 0 : i32
    %c0_i32_0 = arith.constant 0 : i32
    %c0_i32_1 = arith.constant 0 : i32
    return %c0_i32, %c0_i32_0 : i32, i32
  }
  func.func @transform_2(%arg0: i32) -> (i32, i32) {
    %c0_i32 = arith.constant 0 : i32
    %c0_i32_0 = arith.constant 0 : i32
    %c0_i32_1 = arith.constant 0 : i32
    return %c0_i32, %c0_i32_0 : i32, i32
  }
  func.func @transform_3(%arg0: i32) -> (i32, i32) {
    %c0_i32 = arith.constant 0 : i32
    %c0_i32_0 = arith.constant 0 : i32
    %c0_i32_1 = arith.constant 0 : i32
    return %c0_i32, %c0_i32_0 : i32, i32
  }
  func.func @transform_4(%arg0: i32) -> (i32, i32) {
    %c0_i32 = arith.constant 0 : i32
    %c0_i32_0 = arith.constant 0 : i32
    %c0_i32_1 = arith.constant 0 : i32
    return %c0_i32, %c0_i32_0 : i32, i32
  }
  func.func @transform_5(%arg0: i32) -> (i32, i32, i32) {
    %c0_i32 = arith.constant 0 : i32
    %c0_i32_0 = arith.constant 0 : i32
    %c0_i32_1 = arith.constant 0 : i32
    return %arg0, %c0_i32, %c0_i32_0 : i32, i32, i32
  }
}

</mosaic_0001>

<bundles_post_ra>
// kernel: tpu_custom_call.1
= control target key start
LH: loop header
LB: loop body
LE: loop exit
PB: predicated region body
PF: predicated region fallthrough
CT: control target
= control target key end

     0   :  { %10 = vsyncpa [#allocation3], 0  ;;  %s770_s0 = inlined_call_operand.hbm [shape: f32[2,4,256], index: 0, kind: input, shape index: {}]   ;;  %s771_s1 = inlined_call_operand.vmem [shape: f32[4,8], index: 1, kind: input, shape index: {}]   ;;  %s772_s2 = inlined_call_operand.vmem [shape: f32[1,8], index: 2, kind: input, shape index: {}]   ;;  %s773_s3 = inlined_call_operand.vmem [shape: f32[8,4], index: 3, kind: input, shape index: {}]   ;;  %s774_s4 = inlined_call_operand.vmem [shape: f32[1,4], index: 4, kind: input, shape index: {}]   ;;  %s775_s5 = inlined_call_operand.hbm [shape: f32[2,4,256], index: 5, kind: output, shape index: {}]  }
   0x1   :  { %12 = vsyncpa [#allocation3 + $0x1], 0 }
   0x2   :  { %13 = vsyncpa [#allocation4], 0 }
   0x3   :  { %15 = vsyncpa [#allocation4 + $0x1], 0  ;;  %s593_s18 = smov 0   ;;  %s595_s19 = smov 0  }
   0x4   :  { %s597_s20 = smov 0   ;;  %s599_s21 = smov 0  }
   0x5 LB: > { %s614_s22 = sadd.s32 4294967295, %s558_s21   ;;  %s393_s23 = sadd.s32 4294967294, %s558_s21   ;;  %s558_s21 = sphi %s599_s21, %s790_s21   ;;  %s554_s20 = sphi %s597_s20, %s789_s20   ;;  %s550_s19 = sphi %s595_s19, %s788_s19   ;;  %s546_s18 = sphi %s593_s18, %s787_s18  }
   0x6   : > { %s618_s24 = sadd.s32 1, %s558_s21   ;;  %s28_s25 = sadd.s32 1, %s554_s20 }
   0x7   : > { %s25_s26 = ssub.s32 %s558_s21, %s618_s24  ;;  %p35_p0 = scmp.ne.s32.totalorder %s554_s20, %s550_s19 }
   0x8   : > { %p26_p1 = scmp.eq.s32.totalorder %s25_s26, 0  ;;  %p36_p2 = scmp.eq.s32.totalorder %s558_s21, 0 }
   0x9   : > { %p41_p3 = scmp.ne.s32.totalorder %s550_s19, %s546_s18  ;;  %p42_p4 = scmp.eq.s32.totalorder %s614_s22, 0 }
   0xa   : > { %s630_s27 = scalar_select %p26_p1, %s554_s20, %s28_s25  }
   0xb   : > { %p632_p5 = por %p36_p2, %p35_p0  ;;  %p636_p6 = por %p42_p4, %p41_p3 }
   0xc   : > { %p149_p7 = scmp.eq.s32.totalorder %s614_s22, 1  ;;  %p155_p8 = scmp.eq.s32.totalorder %s393_s23, 1 }
   0xd   : > { %p422_p10 = scmp.lt.s32.totalorder %s558_s21, 2  ;;  %s187_s7 = sand.u32 1, %s554_s20  }
   0xe   : > { %p643_p11 = por %p149_p7, %p35_p0  ;;  %p647_p12 = por %p155_p8, %p41_p3 }
   0xf   : > { %s408_s8 = sshll.u32 %s558_s21, 7  ;;  %s396_s9 = sshll.u32 %s187_s7, 3 }
  0x10   : > { %s779_s30 = scalar_select %p643_p11, 1, 0 }
  0x11   : > { %s780_s6 = scalar_select %p647_p12, 1, 0 }
  0x12   : > { %s656_s12 = scalar_lea.hbm %s770_s0, %s408_s8  ;;  %s191_s13 = scalar_lea.vmem [#allocation2], %s396_s9 }
  0x13   : > { %s199_s14 = sshll.u32 %s191_s13, 4  ;;  %p660_p13 = pnand %p422_p10, %p632_p5  ;;  %s664_s14 = int_to_ptr.vmem [resolvable:$true] %s199_s14 }
  0x14   : > { %s188_s16 = scalar_lea.sflag [#allocation3], %s187_s7  ;;  %s462_s17 = scalar_lea.hbm %s656_s12, 128 }
  0x15   : > { %p463_p2 = scmp.ne.s32.totalorder %s656_s12, %s462_s17  ;;  %p464_p3 = pneg %p660_p13 }
  0x16   : > { %s467_s26 = scalar_lea.hbm %s770_s0, 256  ;;  %p468_p5 = scmp.lt.u32.totalorder %s656_s12, %s770_s0 }
  0x17   : > { %p465_p4 = pnand %p464_p3, %p463_p2  ;;  %p469_p8 = scmp.lt.u32.totalorder %s467_s26, %s462_s17 }
  0x18   : > { %p471_p9 = scmp.lt.u32.totalorder %s462_s17, %s656_s12 }
  0x19   : > { %p466_p7 = pneg %p465_p4  ;;  %p470_p10 = por %p469_p8, %p468_p5 }
  0x1b   : > { %p472_p0 = por %p471_p9, %p470_p10 }
  0x1d   : > { %p473_p1 = pnand %p472_p0, %p466_p7 }
  0x1f   : > { %476 = shalt.err (!%p473_p1)
}
  0x20   : > { %s477_s7 = scalar_lea.vmem %s664_s14, 128  ;;  %s560_s9 = smov [#allocation2]  }
  0x21   : > { %p478_p2 = scmp.ne.s32.totalorder %s664_s14, %s477_s7  ;;  %s482_s10 = sshll.u32 %s560_s9, 4  ;;  %s483_s10 = int_to_ptr.vmem [resolvable:$false] %s482_s10 }
  0x22   : > { %s484_s11 = scalar_lea.vmem %s483_s10, 256  ;;  %p485_p11 = scmp.lt.s32.totalorder %s664_s14, %s483_s10 }
  0x23   : > { %p480_p4 = pnand %p478_p2, %p464_p3  ;;  %p486_p5 = scmp.lt.s32.totalorder %s484_s11, %s477_s7 }
  0x25   : > { %p481_p12 = pneg %p480_p4  ;;  %p487_p8 = por %p486_p5, %p485_p11 }
  0x27   : > { %p488_p9 = pnand %p487_p8, %p481_p12 }
  0x29   : > { %491 = shalt.err (!%p488_p9)
}
  0x2a   : > { %417 = dma.hbm_to_vmem [thread:$0]  (!%p660_p13), %s656_s12, 128, %s664_s14, %s188_s16  }
  0x2b   : > { %p782_p0 = scmp.lt.s32.totalorder %s558_s21, 3  ;;  %p783_p1 = scmp.ge.s32.totalorder %s558_s21, 1 }
  0x2d   : > { %p205_p3 = pnand %p783_p1, %p782_p0 }
  0x2e   : > { %s698_s13 = sand.u32 (!%p205_p3), 1, %s550_s19  }
  0x2f   : > { %208 = sbr.rel (%p205_p3) target bundleno = 519 (0x207), region = 40  ;;  %s400_s17 = sshll.u32 (!%p205_p3), %s698_s13, 3 }
  0x30   : > { %s211_s23 = scalar_lea.sflag (!%p205_p3), [#allocation3], %s698_s13  ;;  %s214_s15 = scalar_lea.vmem (!%p205_p3), [#allocation2], %s400_s17 }
  0x36   : > { %537 = dma.done.wait (%p636_p6), %s211_s23, 128  }
  0x37   : > { %539 = vsyncadd (%p636_p6), %s211_s23, 4294967168  ;;  %vm245_vm0 = vcmask 1043456   ;;  %v241_v0 = vld [vmem:[%s214_s15] sm:$0xff]  ;;  %vm254_vm1 = vcmask 60416   ;;  %v265_v13 = vlaneseq  ;;  %vm274_vm2 = vcmask 31744   ;;  %s409_s7 = sshll.u32 %s614_s22, 7 }
  0x38   : > { %v243_v1 = vcombine.high %v241_v0, %v241_v0  ;;  %v246_v2 = vsel %vm245_vm0, %v241_v0, 0.0  ;;  %v252_v5 = vld [vmem:[%s771_s1] sm:$0xf]  ;;  %v561_v40 = vmov 839922192   ;;  %s240_s9 = scalar_lea.vmem [#allocation5], %s400_s17  ;;  %s726_s15 = scalar_lea.hbm %s775_s5, %s409_s7 }
  0x39   : > { %v266_v16 = vshrl.u32 %v265_v13, 7  ;;  %v262_v17 = vld [vmem:[%s772_s2] sm:$0x1]  ;;  %v299_v41 = vunpack.c.l.s4 %v561_v40  ;;  %s323_s10 = sshll.u32 %s240_s9, 4  ;;  %s309_s12 = scalar_lea.sflag [#allocation4], %s698_s13  ;;  %s728_s10 = int_to_ptr.vmem [resolvable:$true] %s323_s10 }
  0x3a   : > { %v247_v3 = vsel %vm245_vm0, %v243_v1, 0.0  ;;  %v272_v23 = vld [vmem:[%s773_s3] sm:$0xff]  ;;  %s492_s14 = scalar_lea.vmem %s728_s10, 128  ;;  %p784_p11 = scmp.ne.s32.totalorder %s779_s30, 0 }
  0x3b   : > { %v248_v4 = vadd.f32 %v247_v3, %v246_v2  ;;  %v267_v20 = vsub.s32 0, %v266_v16  ;;  %v282_v32 = vld [vmem:[%s774_s4] sm:$0x1]  ;;  %v300_v42 = vunpack.c.0.s8 %v299_v41  ;;  %p493_p6 = scmp.ne.s32.totalorder %s728_s10, %s492_s14  ;;  %s562_s22 = smov [#allocation5]  }
  0x3c   : > { %s496_s17 = sshll.u32 %s562_s22, 4  ;;  %s497_s17 = int_to_ptr.vmem [resolvable:$false] %s496_s17 }
  0x3d   : > { %249 = vadd.xlane.f32.xlu0 %v248_v4  ;;  %v303_v43 = vsub.s32 %v300_v42, %v266_v16  ;;  %p494_p12 = pnand %p493_p6, %p784_p11  ;;  %s498_s29 = scalar_lea.vmem %s497_s17, 256 }
  0x3e   : > { %p499_p7 = scmp.lt.s32.totalorder %s728_s10, %s497_s17  ;;  %p500_p10 = scmp.lt.s32.totalorder %s498_s29, %s492_s14 }
  0x3f   : > { %p495_p13 = pneg %p494_p12 }
  0x40   : > { %p501_p2 = por %p500_p10, %p499_p7 }
  0x42   : > { %p502_p4 = pnand %p501_p2, %p495_p13 }
  0xca   : > { %v250_v6 = vpop.xlane.xlu0 %249 }
  0xcb   : > { %v251_v7 = vmul.f32 0.00390625, %v250_v6 }
  0xcd   : > { %v253_v8 = vmul.f32 %v252_v5, %v251_v7 }
  0xcf   : > { %v255_v9 = vsel %vm254_vm1, %v253_v8, 0.0 }
  0xd0   : > { %v256_v10 = vrot.slane %v255_v9, 4 }
  0xd2   : > { %v257_v11 = vadd.f32 %v256_v10, %v255_v9 }
  0xd4   : > { %v258_v12 = vrot.slane %v257_v11, 2 }
  0xd6   : > { %v259_v14 = vadd.f32 %v258_v12, %v257_v11 }
  0xd8   : > { %v260_v15 = vrot.slane %v259_v14, 1 }
  0xda   : > { %v261_v18 = vadd.f32 %v260_v15, %v259_v14 }
  0xdc   : > { %v263_v19 = vadd.f32 %v262_v17, %v261_v18 }
  0xde   : > { %v264_v21 = vmax.f32 %v263_v19, 0.0 }
  0xe0   : > { %v268_v22 = vrot.slane %v264_v21, %v267_v20 }
  0xe2   : > { %270 = vbcast.lane.b32.xlu0 %v268_v22, 256 }
 0x154   : > { %v271_v24 = vpop.permute.xlu0 %270 }
 0x155   : > { %v273_v25 = vmul.f32 %v272_v23, %v271_v24 }
 0x157   : > { %v275_v26 = vsel %vm274_vm2, %v273_v25, 0.0 }
 0x158   : > { %v276_v27 = vrot.slane %v275_v26, 4 }
 0x15a   : > { %v277_v28 = vadd.f32 %v276_v27, %v275_v26 }
 0x15c   : > { %v278_v29 = vrot.slane %v277_v28, 2 }
 0x15e   : > { %v279_v30 = vadd.f32 %v278_v29, %v277_v28 }
 0x160   : > { %v280_v31 = vrot.slane %v279_v30, 1 }
 0x162   : > { %v281_v33 = vadd.f32 %v280_v31, %v279_v30 }
 0x164   : > { %v283_v34 = vadd.f32 %v282_v32, %v281_v33 }
 0x166   : > { %v402_v35 = vmul.f32 -1.442695, %v283_v34 }
 0x168   : > { %458 = vpow2.f32 %v402_v35 }
 0x172   : > { %v459_v36 = vpop.eup %458 }
 0x173   : > { %v287_v37 = vadd.f32 1.0, %v459_v36 }
 0x175   : > { %460 = vrcp.f32 %v287_v37 }
 0x17f   : > { %v461_v38 = vpop.eup %460 }
 0x180   : > { %v293_v39 = vrot.slane %v461_v38, %v267_v20 }
 0x182   : > { %295 = vbcast.lane.b32.xlu1 %v293_v39, 256 }
 0x1f4   : > { %v296_v44 = vpop.permute.xlu1 %295 }
 0x1f5   : > { %v304_v45 = vrot.slane %v296_v44, %v303_v43 }
 0x1f7   : > { %v306_v46 = vmul.f32 %v304_v45, %v241_v0 }
 0x1f9   : > { %307 = vst [vmem:[%s240_s9] sm:$0xff] %v306_v46 }
 0x1fa   : > { %505 = shalt.err (!%p502_p4)
}
 0x1fb   : > { %s506_s13 = scalar_lea.hbm %s726_s15, 128  ;;  %s510_s26 = scalar_lea.hbm %s775_s5, 256 }
 0x1fc   : > { %p507_p5 = scmp.ne.s32.totalorder %s726_s15, %s506_s13  ;;  %p511_p0 = scmp.lt.u32.totalorder %s726_s15, %s775_s5 }
 0x1fd   : > { %p512_p1 = scmp.lt.u32.totalorder %s510_s26, %s506_s13  ;;  %p514_p6 = scmp.lt.u32.totalorder %s506_s13, %s726_s15 }
 0x1fe   : > { %p508_p8 = pnand %p507_p5, %p784_p11 }
 0x1ff   : > { %p513_p3 = por %p512_p1, %p511_p0 }
 0x200   : > { %p509_p9 = pneg %p508_p8 }
 0x201   : > { %p515_p12 = por %p514_p6, %p513_p3 }
 0x203   : > { %p516_p13 = pnand %p515_p12, %p509_p9 }
 0x205   : > { %519 = shalt.err (!%p516_p13)
}
 0x206   : > { %412 = dma.vmem_to_hbm [thread:$0]  (%p784_p11), %s728_s10, 128, %s726_s15, %s309_s12  }
 0x207 PF: > { %s335_s7 = sand.u32 1, %s546_s18   ;;  %p785_p7 = scmp.ne.s32.totalorder %s780_s6, 0 }
 0x208   : > { %p786_p10 = scmp.ge.s32.totalorder %s558_s21, 2  ;;  %s336_s9 = scalar_lea.sflag [#allocation4], %s335_s7 }
 0x20a   : > { %p419_p2 = pnand %p786_p10, %p785_p7 }
 0x20c   : > { %541 = dma.done.wait (!%p419_p2), %s336_s9, 128  }
 0x20d   : > { %543 = vsyncadd (!%p419_p2), %s336_s9, 4294967168  ;;  %p18_p4 = scmp.ge.s32.totalorder %s618_s24, 4   ;;  %s787_s18 = smov %s550_s19 }
 0x20e   : > { %s788_s19 = smov %s554_s20  ;;  %s789_s20 = smov %s630_s27 }
 0x20f   : > { %s790_s21 = smov %s618_s24  ;;  %20 = sbr.rel (!%p18_p4) target bundleno = 5 (0x5), region = 85 }
 0x216   :  { %341 = vsyncpa [#allocation3], 1 }
 0x217   :  { %343 = vsyncpa [#allocation3 + $0x1], 1 }
 0x218   :  { %344 = vsyncpa [#allocation4], 1 }
 0x219   :  { %346 = vsyncpa [#allocation4 + $0x1], 1 }

</bundles_post_ra>
